<compile_context>
chip_gen: v7x
topology: tpu7x:2x2x1
jax: 0.10.0
libtpu: 0.0.40
codegen_flags: <defaults>
</compile_context>

<pallas_src>
import jax
import jax.numpy as jnp
from jax.experimental import pallas as pl
from jax.experimental.pallas import tpu as pltpu

_EPS = 1e-12                      # matches torch.nn.functional.normalize eps
_VMEM_TILE_BUDGET = 48 << 20      # conservative: fits v7x's 64 MiB physical VMEM


def _round_up(x, m):
    return (x + m - 1) // m * m


def _l2_normalize(x):
    # F.normalize(x, p=2, dim=-1): x / max(||x||_2, eps)
    # == x * rsqrt(max(||x||_2^2, eps^2))   (sqrt is monotone)
    sumsq = jnp.sum(x * x, axis=-1, keepdims=True)
    return x * jax.lax.rsqrt(jnp.maximum(sumsq, _EPS * _EPS))


# --------------------------------------------------------------------------- #
# Kernel
# --------------------------------------------------------------------------- #
def cos_head_kernel(feat_ref, w_ref, out_ref):
    """Fused cosine-classifier head.

    feat_ref : (TB, C)      pooled backbone features (batch tile)
    w_ref    : (C, N_pad)   pre-normalized, temperature-folded, fused classifier
                            matrix (fc[:n1] ++ dummy), lane-padded to 128
    out_ref  : (TB, N_pad)  logits (lane-dense store)
    """
    f = feat_ref[...].astype(jnp.float32)                     # (TB, C)
    sumsq = jnp.sum(f * f, axis=-1, keepdims=True)
    f = f * jax.lax.rsqrt(jnp.maximum(sumsq, _EPS * _EPS))    # F.normalize via EUP rsqrt

    w = w_ref[...]                                            # already normalized * T
    out_ref[...] = jnp.dot(f.astype(w.dtype), w,
                           preferred_element_type=jnp.float32
                           ).astype(out_ref.dtype)


# --------------------------------------------------------------------------- #
# One-time weight preparation (hoisted out of the per-forward path)
# --------------------------------------------------------------------------- #
def prepare_cos_classifier(fc_weight, dummy_weight, *, base_class, stage=0,
                           temperature=16.0, matmul_dtype=jnp.bfloat16):
    """Builds the fused (C, N_pad) classifier matrix once; reuse across calls."""
    n1 = base_class * (stage + 1)
    n2 = dummy_weight.shape[0]
    n_out = n1 + n2

    w1 = _l2_normalize(fc_weight.astype(jnp.float32))[:n1]          # (n1, C)
    w2 = _l2_normalize(dummy_weight.astype(jnp.float32))            # (n2, C)
    w = (temperature * jnp.concatenate([w1, w2], axis=0)).T         # (C, n_out)
    n_pad = _round_up(n_out, 128)
    w = jnp.pad(w, ((0, 0), (0, n_pad - n_out))).astype(matmul_dtype)
    return w, n_out


def _pick_batch_tile(B, C, n_pad, batch_tile, mm_item, out_item):
    """Largest batch tile fitting the VMEM budget, then balanced >=2-way split
    for v7x's 2 TensorCores when the batch is big enough."""
    b8 = _round_up(max(B, 8), 8)
    tb = min(_round_up(max(batch_tile, 8), 8), b8)

    def vmem_need(t):
        # 2x double-buffered features + 2x (constant but double-buffered)
        # weight + 2x output tile.
        return 2 * t * C * mm_item + 2 * C * n_pad * mm_item + 2 * t * n_pad * out_item

    while tb > 8 and vmem_need(tb) > _VMEM_TILE_BUDGET:
        tb = max(8, _round_up(tb // 2, 8))

    n_steps = max(1, pl.cdiv(b8, tb))
    if n_steps == 1 and b8 >= 16:
        n_steps = 2                       # shard batch axis across both v7x TCs
    tb = _round_up(pl.cdiv(b8, n_steps), 8)
    b_pad = _round_up(b8, tb)
    return tb, b_pad, vmem_need(tb)


# --------------------------------------------------------------------------- #
# Forward (MYNET.forward, mode='cos')
# --------------------------------------------------------------------------- #
def mynet_forward_cos(x_nchw, w_fused, n_out, *, batch_tile=512,
                      out_dtype=jnp.float32, xla_batch_threshold=8):
    """MYNET.forward (mode='cos'): logits of shape (B, base*(stage+1) + n_dummy).

    `w_fused` / `n_out` come from prepare_cos_classifier(); x_nchw is the
    backbone feature map (B, C, H, W).
    """
    B = x_nchw.shape[0]
    C, n_pad = w_fused.shape

    # encode(): adaptive_avg_pool2d((1,1)) + squeeze, done in XLA so the kernel
    # only consumes (B, C) — HW-times fewer HBM bytes, no transpose pass.
    pooled = jnp.mean(x_nchw, axis=(2, 3), dtype=jnp.float32)        # (B, C)

    # Tiny batches: one small dot; pallas_call launch overhead would dominate.
    if B <= xla_batch_threshold:
        f = _l2_normalize(pooled)
        out = jnp.dot(f.astype(w_fused.dtype), w_fused,
                      preferred_element_type=jnp.float32)
        return out[:, :n_out].astype(out_dtype)

    mm_item = jnp.dtype(w_fused.dtype).itemsize
    out_item = jnp.dtype(out_dtype).itemsize
    tb, b_pad, vmem_need = _pick_batch_tile(B, C, n_pad, batch_tile,
                                            mm_item, out_item)

    feat = pooled.astype(w_fused.dtype)   # halve DMA bytes in bf16 mode;
    if b_pad != B:                        # normalize still runs in f32 in-kernel
        feat = jnp.pad(feat, ((0, b_pad - B), (0, 0)))

    grid = (b_pad // tb,)
    vmem_limit = int(min(max(vmem_need + (2 << 20), 32 << 20), 56 << 20))

    cost = pl.CostEstimate(
        flops=2 * b_pad * C * n_pad,
        transcendentals=b_pad,
        bytes_accessed=b_pad * C * mm_item + C * n_pad * mm_item
                       + b_pad * n_pad * out_item,
    )

    out_padded = pl.pallas_call(
        cos_head_kernel,
        out_shape=jax.ShapeDtypeStruct((b_pad, n_pad), out_dtype),
        grid_spec=pltpu.PrefetchScalarGridSpec(
            num_scalar_prefetch=0,
            grid=grid,
            in_specs=[
                pl.BlockSpec((tb, C), lambda b: (b, 0)),
                pl.BlockSpec((C, n_pad), lambda b: (0, 0)),
            ],
            out_specs=pl.BlockSpec((tb, n_pad), lambda b: (b, 0)),
        ),
        compiler_params=pltpu.CompilerParams(
            dimension_semantics=("parallel",),
            vmem_limit_bytes=vmem_limit),
        cost_estimate=cost,
    )(feat, w_fused)

    return out_padded[:B, :n_out]


# --------------------------------------------------------------------------- #
# Pure-JAX reference (mirrors MYNET.forward, mode='cos', in f32)
# --------------------------------------------------------------------------- #
def _reference(x_nchw, fc_weight, dummy_weight, *, base_class, temperature,
               stage=0):
    pooled = jnp.mean(x_nchw, axis=(2, 3))                           # encode()
    f = _l2_normalize(pooled)
    x1 = f @ _l2_normalize(fc_weight).T
    x2 = f @ _l2_normalize(dummy_weight).T
    out = jnp.concatenate([x1[:, : base_class * (stage + 1)], x2], axis=1)
    return temperature * out


if __name__ == "__main__":
    # Shapes consistent with the module (cifar10 branch: num_features=640).
    C, H, W = 640, 4, 4
    num_classes = 16      # args.num_classes (pre_allocate)
    base_class = 8        # args.base_class
    temperature = 16.0    # args.temperature
    stage = 0
    n_out_expected = base_class * (stage + 1) + (num_classes - base_class)

    key = jax.random.PRNGKey(0)
    k_w, k_x1, k_x2 = jax.random.split(key, 3)

    # nn.init.orthogonal_(fc.weight): orthonormal rows of shape (Nc, C).
    a = jax.random.normal(k_w, (C, num_classes), dtype=jnp.float32)
    q, _ = jnp.linalg.qr(a)                       # (C, Nc), orthonormal columns
    fc_weight = q.T                               # (Nc, C), orthonormal rows
    # dummy_orthogonal_classifier.weight = fc.weight[base_class:, :]
    dummy_weight = fc_weight[base_class:, :]

    # ---- Test 1: f32 operands, tiny batch, Pallas path forced (tight check) --
    B1 = 2
    x1 = jax.random.normal(k_x1, (B1, C, H, W), dtype=jnp.float32)
    w_f32, n_out = prepare_cos_classifier(
        fc_weight, dummy_weight, base_class=base_class, stage=stage,
        temperature=temperature, matmul_dtype=jnp.float32)
    out1 = mynet_forward_cos(x1, w_f32, n_out, xla_batch_threshold=0)
    out1 = jax.block_until_ready(out1)
    ref1 = _reference(x1, fc_weight, dummy_weight, base_class=base_class,
                      temperature=temperature, stage=stage)
    assert out1.shape == (B1, n_out_expected)
    assert jnp.allclose(out1, ref1, atol=1e-4, rtol=1e-4), "f32 mismatch vs reference"

    # ---- Test 2: bf16 perf default, multi-tile grid (loose check) -----------
    B2 = 24
    x2 = jax.random.normal(k_x2, (B2, C, H, W), dtype=jnp.float32)
    w_bf16, n_out2 = prepare_cos_classifier(
        fc_weight, dummy_weight, base_class=base_class, stage=stage,
        temperature=temperature)                  # default matmul_dtype=bf16
    out2 = mynet_forward_cos(x2, w_bf16, n_out2)  # B2 > threshold -> Pallas
    out2 = jax.block_until_ready(out2)
    ref2 = _reference(x2, fc_weight, dummy_weight, base_class=base_class,
                      temperature=temperature, stage=stage)
    assert out2.shape == (B2, n_out_expected)
    assert jnp.allclose(out2, ref2, atol=2e-1, rtol=5e-2), "bf16 mismatch vs reference"

    print("KERNEL_OK")
</pallas_src>

<mosaic_0001>
module attributes {stable_mosaic.version = 11 : i64} {
  func.func @cos_head_kernel(%arg0: i32, %arg1: memref<8x640xf32, #tpu.memory_space<vmem>>, %arg2: memref<640x128xf32, #tpu.memory_space<vmem>>, %arg3: memref<8x128xf32, #tpu.memory_space<vmem>>) attributes {dimension_semantics = [#tpu.dimension_semantics<parallel>], iteration_bounds = array<i64: 1>, scalar_prefetch = 0 : i64, scratch_operands = 0 : i64, tpu.core_type = #tpu.core_type<tc>, window_params = [{transform_indices = @transform_0, window_bounds = array<i64: 8, 640>}, {pipeline_mode = #tpu.pipeline_mode<synchronous>, transform_indices = @transform_1, window_bounds = array<i64: 640, 128>}, {transform_indices = @transform_2, window_bounds = array<i64: 8, 128>}]} {
    %c0 = arith.constant 0 : index
    %c0_0 = arith.constant 0 : index
    %0 = vector.load %arg1[%c0, %c0_0] : memref<8x640xf32, #tpu.memory_space<vmem>>, vector<8x640xf32>
    %1 = arith.mulf %0, %0 : vector<8x640xf32>
    %cst = arith.constant dense<0.000000e+00> : vector<8xf32>
    %2 = vector.multi_reduction <add>, %1, %cst [1] : vector<8x640xf32> to vector<8xf32>
    %3 = vector.shape_cast %2 : vector<8xf32> to vector<8x1xf32>
    %cst_1 = arith.constant 1.000000e-24 : f32
    %4 = vector.broadcast %cst_1 : f32 to vector<8x1xf32>
    %5 = arith.maximumf %3, %4 : vector<8x1xf32>
    %6 = math.rsqrt %5 : vector<8x1xf32>
    %7 = vector.broadcast %6 : vector<8x1xf32> to vector<8x640xf32>
    %8 = arith.mulf %0, %7 : vector<8x640xf32>
    %c0_2 = arith.constant 0 : index
    %c0_3 = arith.constant 0 : index
    %9 = vector.load %arg2[%c0_2, %c0_3] : memref<640x128xf32, #tpu.memory_space<vmem>>, vector<640x128xf32>
    %cst_4 = arith.constant dense<0.000000e+00> : vector<8x128xf32>
    %10 = tpu.matmul %8, %9, %cst_4 {dimension_numbers = #tpu.dot_dimension_numbers<[1], [0], [0], [1], [0, 0, 1, 1], [], []>} : vector<8x640xf32>, vector<640x128xf32>, vector<8x128xf32> -> vector<8x128xf32>
    %c0_5 = arith.constant 0 : index
    %c0_6 = arith.constant 0 : index
    %11 = vector.load %arg3[%c0_5, %c0_6] : memref<8x128xf32, #tpu.memory_space<vmem>>, vector<8x128xf32>
    tpu.vector_store %arg3[%c0_5, %c0_6], %10 {strides = array<i32>} : memref<8x128xf32, #tpu.memory_space<vmem>>, vector<8x128xf32>,
    return
  }
  func.func @transform_0(%arg0: i32) -> (i32, i32) {
    %c0_i32 = arith.constant 0 : i32
    %c0_i32_0 = arith.constant 0 : i32
    return %arg0, %c0_i32 : i32, i32
  }
  func.func @transform_1(%arg0: i32) -> (i32, i32) {
    %c0_i32 = arith.constant 0 : i32
    %c0_i32_0 = arith.constant 0 : i32
    %c0_i32_1 = arith.constant 0 : i32
    return %c0_i32, %c0_i32_0 : i32, i32
  }
  func.func @transform_2(%arg0: i32) -> (i32, i32) {
    %c0_i32 = arith.constant 0 : i32
    %c0_i32_0 = arith.constant 0 : i32
    return %arg0, %c0_i32 : i32, i32
  }
}

</mosaic_0001>

<bundles_post_ra>
// kernel: tpu_custom_call.1
= control target key start
LH: loop header
LB: loop body
LE: loop exit
PB: predicated region body
PF: predicated region fallthrough
CT: control target
= control target key end

     0   :  { %7 = vsyncpa [#allocation3], 0  ;;  %s751_s0 = inlined_call_operand.hbm [shape: f32[8,640], index: 0, kind: input, shape index: {}]   ;;  %s752_s1 = inlined_call_operand.hbm [shape: f32[640,128], index: 1, kind: input, shape index: {}]   ;;  %s753_s2 = inlined_call_operand.hbm [shape: f32[8,128], index: 2, kind: output, shape index: {}]  }
   0x1   :  { %8 = vsyncpa [#allocation6], 0 }
   0x2   :  { %9 = vsyncpa [#allocation4], 0  ;;  %s660_s9 = smov [#allocation2]   ;;  %s661_s11 = smov [#allocation5]  }
   0x3   :  { %s16_s10 = sshll.u32 %s660_s9, 4  ;;  %s25_s12 = sshll.u32 %s661_s11, 4  ;;  %s17_s10 = int_to_ptr.vmem [resolvable:$true] %s16_s10  ;;  %s683_s12 = int_to_ptr.vmem [resolvable:$true] %s25_s12 }
   0x4   :  { %s588_s15 = scalar_lea.hbm %s751_s0, 640 }
   0x5   :  { %p589_p0 = scmp.ne.s32.totalorder %s751_s0, %s588_s15  ;;  %p592_p1 = scmp.lt.u32.totalorder %s588_s15, %s751_s0 }
   0x7   :  { %p594_p2 = pnand %p592_p1, %p589_p0 }
   0x9   :  { %597 = shalt.err (!%p594_p2)
}
   0xa   :  { %s598_s20 = scalar_lea.vmem %s17_s10, 640  ;;  %p603_p4 = scmp.lt.s32.totalorder %s17_s10, %s17_s10 }
   0xb   :  { %p599_p3 = scmp.ne.s32.totalorder %s17_s10, %s598_s20  ;;  %p604_p5 = scmp.lt.s32.totalorder %s598_s20, %s598_s20 }
   0xd   :  { %p605_p6 = por %p604_p5, %p603_p4 }
   0xf   :  { %p606_p7 = pnand %p605_p6, %p599_p3 }
  0x11   :  { %609 = shalt.err (!%p606_p7)
}
  0x12   :  { %19 = dma.hbm_to_vmem [thread:$0]  %s751_s0, 640, %s17_s10, [#allocation3]  }
  0x13   :  { %s610_s25 = scalar_lea.hbm %s752_s1, 10240 }
  0x14   :  { %p611_p8 = scmp.ne.s32.totalorder %s752_s1, %s610_s25  ;;  %p614_p9 = scmp.lt.u32.totalorder %s610_s25, %s752_s1 }
  0x16   :  { %p616_p10 = pnand %p614_p9, %p611_p8 }
  0x18   :  { %619 = shalt.err (!%p616_p10)
}
  0x19   :  { %s620_s30 = scalar_lea.vmem %s683_s12, 10240  ;;  %p625_p12 = scmp.lt.s32.totalorder %s683_s12, %s683_s12 }
  0x1a   :  { %p621_p11 = scmp.ne.s32.totalorder %s683_s12, %s620_s30  ;;  %p626_p13 = scmp.lt.s32.totalorder %s620_s30, %s620_s30 }
  0x1c   :  { %p627_p0 = por %p626_p13, %p625_p12 }
  0x1e   :  { %p628_p1 = pnand %p627_p0, %p621_p11 }
  0x20   :  { %631 = shalt.err (!%p628_p1)
}
  0x21   :  { %s662_s0 = smov 128   ;;  %s663_s3 = smov 8  }
  0x22   :  { %31 = dma.hbm_to_vmem [thread:$0]  %s752_s1, 10240, %s683_s12, [#allocation6], %s662_s0, %s662_s0, %s663_s3  }
  0x23   :  { %654 = dma.done.wait [#allocation3], 640  }
  0x24   :  { %655 = vsyncadd [#allocation3], 4294966656 }
  0x25   :  { %656 = dma.done.wait [#allocation6], 10240  }
  0x26   :  { %657 = vsyncadd [#allocation6], 4294957056  ;;  %v714_v0 = vld [vmem:[#allocation2] sm:$0xff]  ;;  %v716_v1 = vld [vmem:[#allocation2 + $0x8] sm:$0xff]  ;;  %vm665_vm0 = vmmov 0   ;;  %s667_s1 = smov [#allocation7]  }
  0x27   :  { %v718_v2 = vld [vmem:[#allocation2 + $0x10] sm:$0xff]  ;;  %v720_v3 = vld [vmem:[#allocation2 + $0x18] sm:$0xff]  ;;  %v722_v4 = vld [vmem:[#allocation2 + $0x20] sm:$0xff]  ;;  %v43_v5 = vmul.f32 %v714_v0, %v714_v0  ;;  %v44_v6 = vmul.f32 %v716_v1, %v716_v1  ;;  %s358_s6 = sshll.u32 %s667_s1, 4  ;;  %s359_s6 = int_to_ptr.vmem [resolvable:$true] %s358_s6 }
  0x28   :  { %v45_v7 = vmul.f32 %v718_v2, %v718_v2  ;;  %v77_v8 = vld [vmem:[#allocation5 + $0x80] sm:$0xff]  ;;  %v78_v9 = vld [vmem:[#allocation5 + $0x88] sm:$0xff]  ;;  %v46_v12 = vmul.f32 %v720_v3, %v720_v3  ;;  %v79_v21 = vld [vmem:[#allocation5 + $0x90] sm:$0xff]  ;;  %v47_v23 = vmul.f32 %v722_v4, %v722_v4  ;;  %s632_s7 = scalar_lea.vmem %s359_s6, 128  ;;  %p637_p3 = scmp.lt.s32.totalorder %s359_s6, %s359_s6 }
  0x29   :  { %v61_v10 = vld [vmem:[#allocation5] sm:$0xff]  ;;  %v62_v11 = vld [vmem:[#allocation5 + $0x8] sm:$0xff]  ;;  %v48_v13 = vadd.f32 %v44_v6, %v43_v5  ;;  %v490_v14 = vpack.c.bf16 %v78_v9, %v77_v8  ;;  %v80_v22 = vld [vmem:[#allocation5 + $0x98] sm:$0xff]  ;;  %p633_p2 = scmp.ne.s32.totalorder %s359_s6, %s632_s7  ;;  %p638_p4 = scmp.lt.s32.totalorder %s632_s7, %s632_s7 }
  0x2a   :  { %v492_v15 = vpack.c.bf16 %v62_v11, %v61_v10  ;;  %v109_v16 = vld [vmem:[#allocation5 + $0x180] sm:$0xff]  ;;  %v110_v17 = vld [vmem:[#allocation5 + $0x188] sm:$0xff]  ;;  %v494_v26 = vpack.c.bf16 %v80_v22, %v79_v21  ;;  %v63_v27 = vld [vmem:[#allocation5 + $0x10] sm:$0xff] }
  0x2b   :  { %v93_v18 = vld [vmem:[#allocation5 + $0x100] sm:$0xff]  ;;  %v522_v19 = vpack.c.bf16 %v110_v17, %v109_v16  ;;  %v94_v20 = vld [vmem:[#allocation5 + $0x108] sm:$0xff]  ;;  %v49_v24 = vadd.f32 %v48_v13, %v45_v7  ;;  %491 = vmatprep.subr.bf16.mxu0 %v490_v14  ;;  %v64_v28 = vld [vmem:[#allocation5 + $0x18] sm:$0xff]  ;;  %p639_p5 = por %p638_p4, %p637_p3 }
  0x2c   :  { %v524_v25 = vpack.c.bf16 %v94_v20, %v93_v18  ;;  %v111_v29 = vld [vmem:[#allocation5 + $0x190] sm:$0xff]  ;;  %493 = vmatpush3.bf16.msra.mxu0 %v492_v15  ;;  %v496_v30 = vpack.c.bf16 %v64_v28, %v63_v27  ;;  %v112_v31 = vld [vmem:[#allocation5 + $0x198] sm:$0xff]  ;;  %v81_v37 = vld [vmem:[#allocation5 + $0xa0] sm:$0xff] }
  0x2d   :  { %523 = vmatprep.subr.bf16.mxu1 %v522_v19  ;;  %v95_v32 = vld [vmem:[#allocation5 + $0x110] sm:$0xff]  ;;  %v96_v33 = vld [vmem:[#allocation5 + $0x118] sm:$0xff]  ;;  %v50_v34 = vadd.f32 %v49_v24, %v46_v12  ;;  %495 = vmatprep.subr.bf16.mxu0 %v494_v26  ;;  %v526_v35 = vpack.c.bf16 %v112_v31, %v111_v29  ;;  %v82_v38 = vld [vmem:[#allocation5 + $0xa8] sm:$0xff]  ;;  %p640_p6 = pnand %p639_p5, %p633_p2 }
  0x2e   :  { %525 = vmatpush3.bf16.msra.mxu1 %v524_v25  ;;  %v528_v36 = vpack.c.bf16 %v96_v33, %v95_v32  ;;  %v65_v39 = vld [vmem:[#allocation5 + $0x20] sm:$0xff]  ;;  %v498_v40 = vpack.c.bf16 %v82_v38, %v81_v37  ;;  %v66_v41 = vld [vmem:[#allocation5 + $0x28] sm:$0xff]  ;;  %v83_v48 = vld [vmem:[#allocation5 + $0xb0] sm:$0xff] }
  0x2f   :  { %v113_v42 = vld [vmem:[#allocation5 + $0x1a0] sm:$0xff]  ;;  %v114_v43 = vld [vmem:[#allocation5 + $0x1a8] sm:$0xff]  ;;  %v51_v44 = vadd.f32 %v50_v34, %v47_v23  ;;  %527 = vmatprep.subr.bf16.mxu1 %v526_v35  ;;  %v500_v49 = vpack.c.bf16 %v66_v41, %v65_v39  ;;  %v84_v50 = vld [vmem:[#allocation5 + $0xb8] sm:$0xff] }
  0x30   :  { %v530_v45 = vpack.c.bf16 %v114_v43, %v113_v42  ;;  %v97_v46 = vld [vmem:[#allocation5 + $0x120] sm:$0xff]  ;;  %v98_v47 = vld [vmem:[#allocation5 + $0x128] sm:$0xff]  ;;  %497 = vmatpush3.bf16.msra.mxu0 %v496_v30  ;;  %v67_v51 = vld [vmem:[#allocation5 + $0x30] sm:$0xff]  ;;  %v502_v53 = vpack.c.bf16 %v84_v50, %v83_v48 }
  0x31   :  { %52 = vadd.xlane.f32.xlu0 %v51_v44  ;;  %v532_v52 = vpack.c.bf16 %v98_v47, %v97_v46  ;;  %v68_v54 = vld [vmem:[#allocation5 + $0x38] sm:$0xff]  ;;  %v115_v55 = vld [vmem:[#allocation5 + $0x1b0] sm:$0xff]  ;;  %499 = vmatprep.subr.bf16.mxu0 %v498_v40  ;;  %v85_v62 = vld [vmem:[#allocation5 + $0xc0] sm:$0xff] }
  0x32   :  { %529 = vmatpush3.bf16.msra.mxu1 %v528_v36  ;;  %v116_v56 = vld [vmem:[#allocation5 + $0x1b8] sm:$0xff]  ;;  %v99_v58 = vld [vmem:[#allocation5 + $0x130] sm:$0xff]  ;;  %v504_v60 = vpack.c.bf16 %v68_v54, %v67_v51  ;;  %v86_v63 = vld [vmem:[#allocation5 + $0xc8] sm:$0xff]  ;;  %v664_v51 = vmov 0.0|0.0  }
  0x33   :  { %531 = vmatprep.subr.bf16.mxu1 %v530_v45  ;;  %v534_v57 = vpack.c.bf16 %v116_v56, %v115_v55  ;;  %v100_v59 = vld [vmem:[#allocation5 + $0x138] sm:$0xff]  ;;  %v506_v5 = vpack.c.bf16 %v86_v63, %v85_v62  ;;  %v69_v6 = vld [vmem:[#allocation5 + $0x40] sm:$0xff]  ;;  %v70_v7 = vld [vmem:[#allocation5 + $0x48] sm:$0xff] }
  0x34   :  { %501 = vmatpush3.bf16.msra.mxu0 %v500_v49  ;;  %v536_v61 = vpack.c.bf16 %v100_v59, %v99_v58  ;;  %v117_v8 = vld [vmem:[#allocation5 + $0x1c0] sm:$0xff]  ;;  %v508_v9 = vpack.c.bf16 %v70_v7, %v69_v6  ;;  %v118_v10 = vld [vmem:[#allocation5 + $0x1c8] sm:$0xff]  ;;  %v87_v15 = vld [vmem:[#allocation5 + $0xd0] sm:$0xff]  ;;  %v666_v6 = vmov 0.0  }
  0x35   :  { %503 = vmatprep.subr.bf16.mxu0 %v502_v53  ;;  %v101_v11 = vld [vmem:[#allocation5 + $0x140] sm:$0xff]  ;;  %v102_v12 = vld [vmem:[#allocation5 + $0x148] sm:$0xff]  ;;  %v538_v13 = vpack.c.bf16 %v118_v10, %v117_v8  ;;  %v88_v16 = vld [vmem:[#allocation5 + $0xd8] sm:$0xff] }
  0x36   :  { %533 = vmatpush3.bf16.msra.mxu1 %v532_v52  ;;  %v540_v14 = vpack.c.bf16 %v102_v12, %v101_v11  ;;  %v510_v17 = vpack.c.bf16 %v88_v16, %v87_v15  ;;  %v71_v18 = vld [vmem:[#allocation5 + $0x50] sm:$0xff]  ;;  %v72_v19 = vld [vmem:[#allocation5 + $0x58] sm:$0xff]  ;;  %v89_v27 = vld [vmem:[#allocation5 + $0xe0] sm:$0xff] }
  0x37   :  { %535 = vmatprep.subr.bf16.mxu1 %v534_v57  ;;  %v119_v20 = vld [vmem:[#allocation5 + $0x1d0] sm:$0xff]  ;;  %v512_v21 = vpack.c.bf16 %v72_v19, %v71_v18  ;;  %v120_v22 = vld [vmem:[#allocation5 + $0x1d8] sm:$0xff]  ;;  %v90_v28 = vld [vmem:[#allocation5 + $0xe8] sm:$0xff] }
  0x38   :  { %505 = vmatpush3.bf16.msra.mxu0 %v504_v60  ;;  %v103_v23 = vld [vmem:[#allocation5 + $0x150] sm:$0xff]  ;;  %v104_v24 = vld [vmem:[#allocation5 + $0x158] sm:$0xff]  ;;  %v542_v25 = vpack.c.bf16 %v120_v22, %v119_v20  ;;  %v73_v29 = vld [vmem:[#allocation5 + $0x60] sm:$0xff]  ;;  %v514_v30 = vpack.c.bf16 %v90_v28, %v89_v27 }
  0x39   :  { %507 = vmatprep.subr.bf16.mxu0 %v506_v5  ;;  %v544_v26 = vpack.c.bf16 %v104_v24, %v103_v23  ;;  %v74_v31 = vld [vmem:[#allocation5 + $0x68] sm:$0xff]  ;;  %v121_v32 = vld [vmem:[#allocation5 + $0x1e0] sm:$0xff]  ;;  %v91_v38 = vld [vmem:[#allocation5 + $0xf0] sm:$0xff] }
  0x3a   :  { %537 = vmatpush3.bf16.msra.mxu1 %v536_v61  ;;  %v122_v33 = vld [vmem:[#allocation5 + $0x1e8] sm:$0xff]  ;;  %v516_v34 = vpack.c.bf16 %v74_v31, %v73_v29  ;;  %v105_v36 = vld [vmem:[#allocation5 + $0x160] sm:$0xff]  ;;  %v92_v40 = vld [vmem:[#allocation5 + $0xf8] sm:$0xff] }
  0x3b   :  { %539 = vmatprep.subr.bf16.mxu1 %v538_v13  ;;  %v546_v35 = vpack.c.bf16 %v122_v33, %v121_v32  ;;  %v106_v37 = vld [vmem:[#allocation5 + $0x168] sm:$0xff]  ;;  %v75_v41 = vld [vmem:[#allocation5 + $0x70] sm:$0xff]  ;;  %v76_v42 = vld [vmem:[#allocation5 + $0x78] sm:$0xff]  ;;  %v518_v43 = vpack.c.bf16 %v92_v40, %v91_v38 }
  0x3c   :  { %509 = vmatpush3.bf16.msra.mxu0 %v508_v9  ;;  %v548_v39 = vpack.c.bf16 %v106_v37, %v105_v36  ;;  %v123_v44 = vld [vmem:[#allocation5 + $0x1f0] sm:$0xff]  ;;  %v124_v45 = vld [vmem:[#allocation5 + $0x1f8] sm:$0xff]  ;;  %v520_v47 = vpack.c.bf16 %v76_v42, %v75_v41  ;;  %v125_v54 = vld [vmem:[#allocation5 + $0x200] sm:$0xff] }
  0x3d   :  { %511 = vmatprep.subr.bf16.mxu0 %v510_v17  ;;  %v107_v46 = vld [vmem:[#allocation5 + $0x170] sm:$0xff]  ;;  %v550_v48 = vpack.c.bf16 %v124_v45, %v123_v44  ;;  %v108_v49 = vld [vmem:[#allocation5 + $0x178] sm:$0xff]  ;;  %v126_v55 = vld [vmem:[#allocation5 + $0x208] sm:$0xff] }
  0x3e   :  { %541 = vmatpush3.bf16.msra.mxu1 %v540_v14  ;;  %v552_v50 = vpack.c.bf16 %v108_v49, %v107_v46  ;;  %v555_v57 = vpack.c.bf16 %v126_v55, %v125_v54  ;;  %v127_v62 = vld [vmem:[#allocation5 + $0x210] sm:$0xff]  ;;  %v128_v63 = vld [vmem:[#allocation5 + $0x218] sm:$0xff]  ;;  %v129_v7 = vld [vmem:[#allocation5 + $0x220] sm:$0xff] }
  0x3f   :  { %543 = vmatprep.subr.bf16.mxu1 %v542_v25  ;;  %v558_v5 = vpack.c.bf16 %v128_v63, %v127_v62  ;;  %v132_v8 = vld [vmem:[#allocation5 + $0x238] sm:$0xff]  ;;  %v133_v9 = vld [vmem:[#allocation5 + $0x240] sm:$0xff]  ;;  %v134_v10 = vld [vmem:[#allocation5 + $0x248] sm:$0xff] }
  0x40   :  { %513 = vmatpush3.bf16.msra.mxu0 %v512_v21  ;;  %v567_v11 = vpack.c.bf16 %v134_v10, %v133_v9  ;;  %v135_v12 = vld [vmem:[#allocation5 + $0x250] sm:$0xff]  ;;  %v136_v13 = vld [vmem:[#allocation5 + $0x258] sm:$0xff]  ;;  %v137_v15 = vld [vmem:[#allocation5 + $0x260] sm:$0xff] }
  0x41   :  { %515 = vmatprep.subr.bf16.mxu0 %v514_v30  ;;  %v570_v14 = vpack.c.bf16 %v136_v13, %v135_v12  ;;  %v138_v16 = vld [vmem:[#allocation5 + $0x268] sm:$0xff]  ;;  %v139_v18 = vld [vmem:[#allocation5 + $0x270] sm:$0xff]  ;;  %v140_v19 = vld [vmem:[#allocation5 + $0x278] sm:$0xff] }
  0x42   :  { %545 = vmatpush3.bf16.msra.mxu1 %v544_v26  ;;  %v573_v17 = vpack.c.bf16 %v138_v16, %v137_v15  ;;  %v576_v20 = vpack.c.bf16 %v140_v19, %v139_v18 }
  0x43   :  { %547 = vmatprep.subr.bf16.mxu1 %v546_v35 }
  0x44   :  { %517 = vmatpush3.bf16.msra.mxu0 %v516_v34 }
  0x45   :  { %519 = vmatprep.subr.bf16.mxu0 %v518_v43 }
  0x46   :  { %549 = vmatpush3.bf16.msra.mxu1 %v548_v39 }
  0x47   :  { %551 = vmatprep.subr.bf16.mxu1 %v550_v48 }
  0x48   :  { %521 = vmatpush3.bf16.msra.mxu0 %v520_v47 }
  0x49   :  { %554 = vmatprep.subr.bf16.mxu0 %v664_v51 }
  0x4a   :  { %553 = vmatpush3.bf16.msra.mxu1 %v552_v50 }
  0xbe   :  { %v53_v52 = vpop.xlane.xlu0 %52 }
  0xbf   :  { %v54_v53 = vmax.f32 %v53_v52, 1e-24 }
  0xc1   :  { %586 = vrsqrt.f32 %v54_v53 }
  0xcb   :  { %v587_v56 = vpop.eup %586 }
  0xcc   :  { %v57_v58 = vmul.f32 %v587_v56, %v716_v1  ;;  %v59_v59 = vmul.f32 %v587_v56, %v720_v3  ;;  %v56_v60 = vmul.f32 %v587_v56, %v714_v0  ;;  %v58_v61 = vmul.f32 %v587_v56, %v718_v2  ;;  %v130_v1 = vld [vmem:[#allocation5 + $0x228] sm:$0xff]  ;;  %v131_v0 = vld [vmem:[#allocation5 + $0x230] sm:$0xff] }
  0xcd   :  { %v561_v3 = vpack.c.bf16 %v130_v1, %v129_v7  ;;  %v564_v2 = vpack.c.bf16 %v132_v8, %v131_v0  ;;  %v60_v21 = vmul.f32 %v587_v56, %v722_v4 }
  0xce   :  { %205 = vmatprep.mubr.f32.mxu0 %v57_v58  ;;  %275 = vmatprep.mubr.f32.mxu1 %v59_v59 }
  0xcf   :  { %206 = vmatmul.mubr.f32.vlgmr.msra.gmra.mrb[0].mxu0 %v56_v60  ;;  %276 = vmatmul.mubr.f32.vlgmr.msra.gmra.mrb[0].mxu1 %v58_v61 }
  0xd0   :  { %556 = vmatpush3.bf16.msra.mxu0 %v555_v57  ;;  %487 = vmatprep.mubr.msk.f32.mxu0 %vm665_vm0, %v666_v6 }
  0xd1   :  { %557 = vmatprep.subr.bf16.mxu0 %v664_v51 }
  0xd4   :  { %559 = vmatpush3.bf16.msra.mxu0 %v558_v5 }
  0xd5   :  { %560 = vmatprep.subr.bf16.mxu0 %v664_v51 }
  0xd8   :  { %562 = vmatpush3.bf16.msra.mxu0 %v561_v3 }
  0xd9   :  { %563 = vmatprep.subr.bf16.mxu0 %v664_v51 }
  0xdc   :  { %565 = vmatpush3.bf16.msra.mxu0 %v564_v2 }
  0xdd   :  { %566 = vmatprep.subr.bf16.mxu0 %v664_v51 }
  0xe0   :  { %568 = vmatpush3.bf16.msra.mxu0 %v567_v11 }
  0xe1   :  { %569 = vmatprep.subr.bf16.mxu0 %v664_v51 }
  0xe4   :  { %571 = vmatpush3.bf16.msra.mxu0 %v570_v14 }
  0xe5   :  { %572 = vmatprep.subr.bf16.mxu0 %v664_v51 }
  0xe8   :  { %574 = vmatpush3.bf16.msra.mxu0 %v573_v17 }
  0xe9   :  { %575 = vmatprep.subr.bf16.mxu0 %v664_v51 }
  0xec   :  { %577 = vmatpush3.bf16.msra.mxu0 %v576_v20 }
  0xef   :  { %488 = vmatmul.mubr.f32.vlgmr.msra.gmra.mrb[2].mxu0 %v60_v21 }
 0x1a2   :  { %v400_v22 = vpop.f32.mrb[0].mxu0  ;;  %v435_v23 = vpop.f32.mrb[0].mxu1 }
 0x1a3   :  { %v401_v24 = vpop.f32.mrb[1].mxu0  ;;  %v436_v25 = vpop.f32.mrb[1].mxu1 }
 0x1a4   :  { %v402_v26 = vadd.f32 %v401_v24, %v400_v22  ;;  %v437_v27 = vadd.f32 %v436_v25, %v435_v23 }
 0x1a6   :  { %v278_v28 = vadd.f32 %v437_v27, %v402_v26 }
 0x1c2   :  { %v347_v29 = vpop.f32.mrb[2].mxu0 }
 0x1c3   :  { %v348_v30 = vadd.f32 %v347_v29, %v278_v28  ;;  %v489_v31 = vpop.f32.mrb[3].mxu0 }
 0x1c5   :  { %351 = vst [vmem:[#allocation7] sm:$0xff] %v348_v30 }
 0x1c6   :  { %643 = shalt.err (!%p640_p6)
}
 0x1c7   :  { %s644_s10 = scalar_lea.hbm %s753_s2, 128 }
 0x1c8   :  { %p645_p7 = scmp.ne.s32.totalorder %s753_s2, %s644_s10  ;;  %p648_p8 = scmp.lt.u32.totalorder %s644_s10, %s753_s2 }
 0x1ca   :  { %p650_p9 = pnand %p648_p8, %p645_p7 }
 0x1cc   :  { %653 = shalt.err (!%p650_p9)
}
 0x1cd   :  { %361 = dma.vmem_to_hbm [thread:$0]  %s359_s6, 128, %s753_s2, [#allocation4]  }
 0x1ce   :  { %658 = dma.done.wait [#allocation4], 128  }
 0x1cf   :  { %659 = vsyncadd [#allocation4], 4294967168 }
 0x1d0   :  { %365 = vsyncpa [#allocation3], 1 }
 0x1d1   :  { %366 = vsyncpa [#allocation6], 1 }
 0x1d2   :  { %367 = vsyncpa [#allocation4], 1 }

</bundles_post_ra>
